<compile_context>
chip_gen: v6e
topology: v6e:2x2x1
jax: 0.10.0
libtpu: 0.0.40
codegen_flags: <defaults>
</compile_context>

<pallas_src>
import functools

import jax
import jax.numpy as jnp
from jax.experimental import pallas as pl
from jax.experimental.pallas import tpu as pltpu


def _optical_flow_kernel(p_ref, pts_ref, grid_ref, o_ref, *, eps):
    """One (batch, pixel-tile) block per grid step.

    p_ref    : (1, 3, 4)   projection matrix P = (K @ T)[:3, :]       (VMEM)
    pts_ref  : (1, 4, Nb)  homogeneous points tile, pixels on lanes   (VMEM)
    grid_ref : (2, Nb)     pixel-index grid tile [row ; col]          (VMEM)
    o_ref    : (1, 2, Nb)  optical-flow tile [v - row ; u - col]      (VMEM)
    """
    p = p_ref[0].astype(jnp.float32)            # (3, 4)
    pts = pts_ref[0].astype(jnp.float32)        # (4, Nb)

    # cam = P @ pts with K = 4: four lane-dense broadcast-FMAs on the VPU.
    cam = p[:, 0:1] * pts[0:1, :]               # (3, 1) * (1, Nb) -> (3, Nb)
    for k in range(1, 4):
        cam = cam + p[:, k:k + 1] * pts[k:k + 1, :]

    denom = cam[2:3, :] + eps                   # (1, Nb)
    u = cam[0:1, :] / denom                     # x pixel coordinates
    v = cam[1:2, :] / denom                     # y pixel coordinates

    g = grid_ref[...].astype(jnp.float32)       # row 0 = y index, row 1 = x index
    # Channel swap [1, 0] fused with the grid subtraction.
    o_ref[0, 0:1, :] = (v - g[0:1, :]).astype(o_ref.dtype)
    o_ref[0, 1:2, :] = (u - g[1:2, :]).astype(o_ref.dtype)


def optical_flow_forward(points, K, T, grid, height, width, eps=1e-7,
                         block_n=32768):
    """optical_flow.forward.

    points : (B, 4, H*W)  homogeneous camera points
    K, T   : (B, 4, 4)    intrinsics / transform
    grid   : (1, 2, H, W) registered pixel-index grid buffer
    returns: (B, 2, H, W) optical flow
    """
    B = points.shape[0]
    N = height * width
    points = points.reshape(B, 4, N)
    grid_flat = grid.reshape(2, N).astype(points.dtype)

    # P = (K @ T)[:, :3, :] — a few hundred bytes; negligible HBM traffic.
    P = jnp.matmul(K, T, precision=jax.lax.Precision.HIGHEST)[:, :3, :]
    P = P.astype(points.dtype)

    # Pixel tile: lane-dense (multiple of 128), clamped to the image size.
    n_pad128 = ((N + 127) // 128) * 128
    Nb = min(((block_n + 127) // 128) * 128, n_pad128)
    n_tiles = (N + Nb - 1) // Nb
    N_pad = n_tiles * Nb

    if N_pad != N:
        pad = N_pad - N
        points = jnp.pad(points, ((0, 0), (0, 0), (0, pad)))
        grid_flat = jnp.pad(grid_flat, ((0, 0), (0, pad)))

    kernel = functools.partial(_optical_flow_kernel, eps=eps)

    flow_flat = pl.pallas_call(
        kernel,
        out_shape=jax.ShapeDtypeStruct((B, 2, N_pad), points.dtype),
        grid=(B, n_tiles),
        in_specs=[
            pl.BlockSpec((1, 3, 4), lambda b, n: (b, 0, 0)),
            pl.BlockSpec((1, 4, Nb), lambda b, n: (b, 0, n)),
            pl.BlockSpec((2, Nb), lambda b, n: (0, n)),
        ],
        out_specs=pl.BlockSpec((1, 2, Nb), lambda b, n: (b, 0, n)),
        compiler_params=pltpu.CompilerParams(
            dimension_semantics=("parallel", "parallel")),
    )(P, points, grid_flat)

    return flow_flat[:, :, :N].reshape(B, 2, height, width)


def _make_grid(height, width):
    """Matches torch.meshgrid(indexing='ij') -> stack -> unsqueeze(0)."""
    ii, jj = jnp.meshgrid(jnp.arange(height, dtype=jnp.float32),
                          jnp.arange(width, dtype=jnp.float32),
                          indexing="ij")
    return jnp.stack([ii, jj])[None]            # (1, 2, H, W)


def _reference(points, K, T, grid, batch_size, height, width, eps=1e-7):
    """Pure-JAX mirror of the PyTorch forward (verification only)."""
    P = jnp.matmul(K, T, precision=jax.lax.Precision.HIGHEST)[:, :3, :]
    cam = jnp.matmul(P, points, precision=jax.lax.Precision.HIGHEST)
    pix = cam[:, :2, :] / (cam[:, 2:3, :] + eps)
    pix = pix.reshape(batch_size, 2, height, width)
    return pix[:, ::-1, :, :] - grid            # [1, 0] channel swap


if __name__ == "__main__":
    key = jax.random.PRNGKey(0)
    k_xy, k_z, k_t = jax.random.split(key, 3)

    B, H, W = 2, 16, 16
    N = H * W

    # Homogeneous 3-D points [X, Y, Z, 1] with Z bounded away from zero so the
    # perspective divide is well-conditioned for the numerical check.
    xy = jax.random.normal(k_xy, (B, 2, N), dtype=jnp.float32)
    z = jax.random.uniform(k_z, (B, 1, N), minval=1.0, maxval=3.0,
                           dtype=jnp.float32)
    ones = jnp.ones((B, 1, N), dtype=jnp.float32)
    points = jnp.concatenate([xy, z, ones], axis=1)          # (B, 4, N)

    # Intrinsics-like K and a small rigid transform T (identity rotation with a
    # batch-varying translation).
    K_single = jnp.array([[8.0, 0.0, 8.0, 0.0],
                          [0.0, 8.0, 8.0, 0.0],
                          [0.0, 0.0, 1.0, 0.0],
                          [0.0, 0.0, 0.0, 1.0]], dtype=jnp.float32)
    K = jnp.broadcast_to(K_single, (B, 4, 4))
    t = 0.05 * jax.random.normal(k_t, (B, 3), dtype=jnp.float32)
    T = jnp.broadcast_to(jnp.eye(4, dtype=jnp.float32), (B, 4, 4))
    T = T.at[:, :3, 3].set(t)

    grid = _make_grid(H, W)                                   # (1, 2, H, W)

    flow = optical_flow_forward(points, K, T, grid, H, W)
    flow = jax.block_until_ready(flow)

    ref = _reference(points, K, T, grid, B, H, W)
    assert flow.shape == (B, 2, H, W)
    assert jnp.allclose(flow, ref, atol=1e-4, rtol=1e-4), "mismatch vs reference"

    print("KERNEL_OK")
</pallas_src>

<mosaic_0001>
module attributes {stable_mosaic.version = 11 : i64} {
  func.func @_optical_flow_kernel(%arg0: i32, %arg1: i32, %arg2: memref<1x3x4xf32, #tpu.memory_space<vmem>>, %arg3: memref<1x4x256xf32, #tpu.memory_space<vmem>>, %arg4: memref<2x256xf32, #tpu.memory_space<vmem>>, %arg5: memref<1x2x256xf32, #tpu.memory_space<vmem>>) attributes {dimension_semantics = [#tpu.dimension_semantics<parallel>, #tpu.dimension_semantics<parallel>], iteration_bounds = array<i64: 2, 1>, scalar_prefetch = 0 : i64, scratch_operands = 0 : i64, tpu.core_type = #tpu.core_type<tc>, window_params = [{transform_indices = @transform_0, window_bounds = array<i64: 1, 3, 4>}, {transform_indices = @transform_1, window_bounds = array<i64: 1, 4, 256>}, {transform_indices = @transform_2, window_bounds = array<i64: 2, 256>}, {transform_indices = @transform_3, window_bounds = array<i64: 1, 2, 256>}]} {
    %c0 = arith.constant 0 : index
    %c0_0 = arith.constant 0 : index
    %c0_1 = arith.constant 0 : index
    %0 = vector.load %arg2[%c0, %c0_0, %c0_1] : memref<1x3x4xf32, #tpu.memory_space<vmem>>, vector<1x3x4xf32>
    %1 = vector.shape_cast %0 : vector<1x3x4xf32> to vector<3x4xf32>
    %c0_2 = arith.constant 0 : index
    %c0_3 = arith.constant 0 : index
    %c0_4 = arith.constant 0 : index
    %2 = vector.load %arg3[%c0_2, %c0_3, %c0_4] : memref<1x4x256xf32, #tpu.memory_space<vmem>>, vector<1x4x256xf32>
    %3 = vector.shape_cast %2 : vector<1x4x256xf32> to vector<4x256xf32>
    %4 = vector.extract_strided_slice %1 {offsets = [0, 0], sizes = [3, 1], strides = [1, 1]} : vector<3x4xf32> to vector<3x1xf32>
    %5 = vector.extract_strided_slice %3 {offsets = [0, 0], sizes = [1, 256], strides = [1, 1]} : vector<4x256xf32> to vector<1x256xf32>
    %6 = vector.broadcast %4 : vector<3x1xf32> to vector<3x256xf32>
    %7 = vector.broadcast %5 : vector<1x256xf32> to vector<3x256xf32>
    %8 = arith.mulf %6, %7 : vector<3x256xf32>
    %9 = vector.extract_strided_slice %1 {offsets = [0, 1], sizes = [3, 1], strides = [1, 1]} : vector<3x4xf32> to vector<3x1xf32>
    %10 = vector.extract_strided_slice %3 {offsets = [1, 0], sizes = [1, 256], strides = [1, 1]} : vector<4x256xf32> to vector<1x256xf32>
    %11 = vector.broadcast %9 : vector<3x1xf32> to vector<3x256xf32>
    %12 = vector.broadcast %10 : vector<1x256xf32> to vector<3x256xf32>
    %13 = arith.mulf %11, %12 : vector<3x256xf32>
    %14 = arith.addf %8, %13 : vector<3x256xf32>
    %15 = vector.extract_strided_slice %1 {offsets = [0, 2], sizes = [3, 1], strides = [1, 1]} : vector<3x4xf32> to vector<3x1xf32>
    %16 = vector.extract_strided_slice %3 {offsets = [2, 0], sizes = [1, 256], strides = [1, 1]} : vector<4x256xf32> to vector<1x256xf32>
    %17 = vector.broadcast %15 : vector<3x1xf32> to vector<3x256xf32>
    %18 = vector.broadcast %16 : vector<1x256xf32> to vector<3x256xf32>
    %19 = arith.mulf %17, %18 : vector<3x256xf32>
    %20 = arith.addf %14, %19 : vector<3x256xf32>
    %21 = vector.extract_strided_slice %1 {offsets = [0, 3], sizes = [3, 1], strides = [1, 1]} : vector<3x4xf32> to vector<3x1xf32>
    %22 = vector.extract_strided_slice %3 {offsets = [3, 0], sizes = [1, 256], strides = [1, 1]} : vector<4x256xf32> to vector<1x256xf32>
    %23 = vector.broadcast %21 : vector<3x1xf32> to vector<3x256xf32>
    %24 = vector.broadcast %22 : vector<1x256xf32> to vector<3x256xf32>
    %25 = arith.mulf %23, %24 : vector<3x256xf32>
    %26 = arith.addf %20, %25 : vector<3x256xf32>
    %27 = vector.extract_strided_slice %26 {offsets = [2, 0], sizes = [1, 256], strides = [1, 1]} : vector<3x256xf32> to vector<1x256xf32>
    %cst = arith.constant 1.000000e-07 : f32
    %28 = vector.broadcast %cst : f32 to vector<1x256xf32>
    %29 = arith.addf %27, %28 : vector<1x256xf32>
    %30 = vector.extract_strided_slice %26 {offsets = [0, 0], sizes = [1, 256], strides = [1, 1]} : vector<3x256xf32> to vector<1x256xf32>
    %31 = arith.divf %30, %29 : vector<1x256xf32>
    %32 = vector.extract_strided_slice %26 {offsets = [1, 0], sizes = [1, 256], strides = [1, 1]} : vector<3x256xf32> to vector<1x256xf32>
    %33 = arith.divf %32, %29 : vector<1x256xf32>
    %c0_5 = arith.constant 0 : index
    %c0_6 = arith.constant 0 : index
    %34 = vector.load %arg4[%c0_5, %c0_6] : memref<2x256xf32, #tpu.memory_space<vmem>>, vector<2x256xf32>
    %35 = vector.extract_strided_slice %34 {offsets = [0, 0], sizes = [1, 256], strides = [1, 1]} : vector<2x256xf32> to vector<1x256xf32>
    %36 = arith.subf %33, %35 : vector<1x256xf32>
    %c0_7 = arith.constant 0 : index
    %c0_8 = arith.constant 0 : index
    %c0_9 = arith.constant 0 : index
    %37 = vector.load %arg5[%c0_7, %c0_8, %c0_9] : memref<1x2x256xf32, #tpu.memory_space<vmem>>, vector<1x1x256xf32>
    %38 = vector.shape_cast %37 : vector<1x1x256xf32> to vector<1x256xf32>
    %39 = vector.shape_cast %36 : vector<1x256xf32> to vector<1x1x256xf32>
    tpu.vector_store %arg5[%c0_7, %c0_8, %c0_9], %39 {strides = array<i32>} : memref<1x2x256xf32, #tpu.memory_space<vmem>>, vector<1x1x256xf32>,
    %40 = vector.extract_strided_slice %34 {offsets = [1, 0], sizes = [1, 256], strides = [1, 1]} : vector<2x256xf32> to vector<1x256xf32>
    %41 = arith.subf %31, %40 : vector<1x256xf32>
    %c0_10 = arith.constant 0 : index
    %c1 = arith.constant 1 : index
    %c0_11 = arith.constant 0 : index
    %42 = vector.load %arg5[%c0_10, %c1, %c0_11] : memref<1x2x256xf32, #tpu.memory_space<vmem>>, vector<1x1x256xf32>
    %43 = vector.shape_cast %42 : vector<1x1x256xf32> to vector<1x256xf32>
    %44 = vector.shape_cast %41 : vector<1x256xf32> to vector<1x1x256xf32>
    tpu.vector_store %arg5[%c0_10, %c1, %c0_11], %44 {strides = array<i32>} : memref<1x2x256xf32, #tpu.memory_space<vmem>>, vector<1x1x256xf32>,
    return
  }
  func.func @transform_0(%arg0: i32, %arg1: i32) -> (i32, i32, i32) {
    %c0_i32 = arith.constant 0 : i32
    %c0_i32_0 = arith.constant 0 : i32
    %c0_i32_1 = arith.constant 0 : i32
    return %arg0, %c0_i32, %c0_i32_0 : i32, i32, i32
  }
  func.func @transform_1(%arg0: i32, %arg1: i32) -> (i32, i32, i32) {
    %c0_i32 = arith.constant 0 : i32
    %c0_i32_0 = arith.constant 0 : i32
    return %arg0, %c0_i32, %arg1 : i32, i32, i32
  }
  func.func @transform_2(%arg0: i32, %arg1: i32) -> (i32, i32) {
    %c0_i32 = arith.constant 0 : i32
    %c0_i32_0 = arith.constant 0 : i32
    return %c0_i32, %arg1 : i32, i32
  }
  func.func @transform_3(%arg0: i32, %arg1: i32) -> (i32, i32, i32) {
    %c0_i32 = arith.constant 0 : i32
    %c0_i32_0 = arith.constant 0 : i32
    return %arg0, %c0_i32, %arg1 : i32, i32, i32
  }
}

</mosaic_0001>

<bundles_post_ra>
// kernel: tpu_custom_call.1
= control target key start
LH: loop header
LB: loop body
LE: loop exit
PB: predicated region body
PF: predicated region fallthrough
CT: control target
= control target key end

     0   :  { %8 = vsyncpa [#allocation3], 0  ;;  %s987_s0 = inlined_call_operand.vmem [shape: f32[2,3,4], index: 0, kind: input, shape index: {}]   ;;  %s988_s1 = inlined_call_operand.hbm [shape: f32[2,4,256], index: 1, kind: input, shape index: {}]   ;;  %s989_s2 = inlined_call_operand.vmem [shape: f32[2,256], index: 2, kind: input, shape index: {}]   ;;  %s990_s3 = inlined_call_operand.hbm [shape: f32[2,2,256], index: 3, kind: output, shape index: {}]  }
   0x1   :  { %10 = vsyncpa [#allocation3 + $0x1], 0 }
   0x2   :  { %11 = vsyncpa [#allocation4], 0 }
   0x3   :  { %13 = vsyncpa [#allocation4 + $0x1], 0  ;;  %s807_s12 = smov 0   ;;  %s809_s13 = smov 0  }
   0x4   :  { %s811_s14 = smov 0   ;;  %s813_s15 = smov 0  }
   0x5   :  { %s815_s16 = smov 0   ;;  %s817_s17 = smov 0  }
   0x6 LB: > { %s570_s18 = sadd.s32 4294967295, %s778_s17   ;;  %s571_s19 = sadd.s32 4294967294, %s778_s17   ;;  %s778_s17 = sphi %s817_s17, %s19_s17   ;;  %s774_s16 = sphi %s815_s16, %s1002_s16   ;;  %s770_s15 = sphi %s813_s15, %s1001_s15   ;;  %s766_s14 = sphi %s811_s14, %s1000_s14   ;;  %s762_s13 = sphi %s809_s13, %s999_s13   ;;  %s758_s12 = sphi %s807_s12, %s998_s12  }
   0x7   : > { %s31_s20 = sadd.s32 1, %s774_s16  ;;  %s66_s21 = sadd.s32 1, %s766_s14 }
   0x8   : > { %p33_p0 = scmp.ge.s32.totalorder %s31_s20, 2  ;;  %p73_p1 = scmp.ne.s32.totalorder %s766_s14, %s762_s13 }
   0x9   : > { %p74_p2 = scmp.eq.s32.totalorder %s778_s17, 0  ;;  %p79_p3 = scmp.ne.s32.totalorder %s762_s13, %s758_s12 }
   0xa   : > { %s1004_s20 = smov (%p33_p0, %s31_s20), 0  ;;  %p80_p5 = scmp.eq.s32.totalorder %s570_s18, 0 }
   0xb   : > { %p848_p4 = por %p74_p2, %p73_p1  ;;  %s61_s23 = ssub.s32 %s774_s16, %s1004_s20 }
   0xc   : > { %p131_p6 = scmp.eq.s32.totalorder %s570_s18, 1  ;;  %p64_p7 = scmp.eq.s32.totalorder %s61_s23, 0 }
   0xd   : > { %p854_p8 = por %p80_p5, %p79_p3  ;;  %p137_p10 = scmp.eq.s32.totalorder %s571_s19, 1 }
   0xe   : > { %p858_p9 = por %p131_p6, %p73_p1  ;;  %p602_p13 = scmp.lt.s32.totalorder %s778_s17, 2 }
   0xf   : > { %s863_s26 = scalar_select %p64_p7, %s766_s14, %s66_s21  }
  0x10   : > { %p865_p11 = por %p137_p10, %p79_p3  ;;  %s173_s28 = sand.u32 1, %s766_s14  }
  0x11   : > { %s575_s29 = sshll.u32 %s173_s28, 3  ;;  %s588_s30 = sshll.u32 %s774_s16, 7 }
  0x12   : > { %s994_s27 = scalar_select %p865_p11, 1, 0 }
  0x13   : > { %s185_s6 = scalar_lea.hbm %s988_s1, %s588_s30  ;;  %s177_s7 = scalar_lea.vmem [#allocation2], %s575_s29 }
  0x14   : > { %s187_s8 = sshll.u32 %s177_s7, 4  ;;  %p878_p0 = pnand %p602_p13, %p848_p4  ;;  %s188_s8 = int_to_ptr.vmem [resolvable:$true] %s187_s8 }
  0x15   : > { %p578_p1 = scmp.ge.s32.totalorder %s778_s17, 1  ;;  %p192_p2 = scmp.lt.s32.totalorder %s778_s17, 3 }
  0x16   : > { %s174_s10 = scalar_lea.sflag [#allocation3], %s173_s28  ;;  %p672_p3 = pneg %p878_p0 }
  0x17   : > { %s683_s11 = scalar_lea.vmem %s188_s8, 128  ;;  %s780_s18 = smov [#allocation2]  }
  0x18   : > { %p684_p5 = scmp.ne.s32.totalorder %s188_s8, %s683_s11  ;;  %s688_s19 = sshll.u32 %s780_s18, 4  ;;  %s689_s19 = int_to_ptr.vmem [resolvable:$false] %s688_s19 }
  0x19   : > { %s690_s21 = scalar_lea.vmem %s689_s19, 256  ;;  %p691_p10 = scmp.lt.s32.totalorder %s188_s8, %s689_s19 }
  0x1a   : > { %p686_p6 = pnand %p684_p5, %p672_p3  ;;  %p692_p12 = scmp.lt.s32.totalorder %s690_s21, %s683_s11 }
  0x1c   : > { %p687_p7 = pneg %p686_p6  ;;  %p693_p4 = por %p692_p12, %p691_p10 }
  0x1e   : > { %p694_p13 = pnand %p693_p4, %p687_p7 }
  0x20   : > { %697 = shalt.err (!%p694_p13)
}
  0x21   : > { %597 = dma.hbm_to_vmem [thread:$0]  (!%p878_p0), %s185_s6, 128, %s188_s8, %s174_s10  }
  0x22   : > { %p193_p11 = pnand %p578_p1, %p192_p2 }
  0x23   : > { %s893_s22 = sand.u32 (!%p193_p11), 1, %s762_s13  }
  0x24   : > { %196 = sbr.rel (%p193_p11) target bundleno = 232 (0xe8), region = 32  ;;  %s579_s23 = sshll.u32 (!%p193_p11), %s893_s22, 3 }
  0x25   : > { %s199_s28 = scalar_lea.sflag (!%p193_p11), [#allocation3], %s893_s22  ;;  %s202_s29 = scalar_lea.vmem (!%p193_p11), [#allocation2], %s579_s23 }
  0x29   : > { %749 = dma.done.wait (%p854_p8), %s199_s28, 128  }
  0x2a   : > { %751 = vsyncadd (%p854_p8), %s199_s28, 4294967168  ;;  %p234_p12 = scmp.lt.s32.totalorder %s770_s15, 1  ;;  %v781_v0 = vmov 0   ;;  %v782_v1 = vmov 2   ;;  %v783_v3 = vmov 1   ;;  %v784_v4 = vmov 3  }
  0x2b   : > { %657 = vset.pattern.permute.xlu0 %v781_v0  ;;  %659 = vset.pattern.permute.xlu1 %v782_v1  ;;  %v254_v5 = vlaneseq  ;;  %v247_v11 = vld [vmem:[%s202_s29] sm:$0xff]  ;;  %v785_v57 = vmov 1966171168   ;;  %s580_s9 = sshll.u32 %s893_s22, 2  ;;  %s589_s10 = sshll.u32 %s770_s15, 6 }
  0x2c   : > { %s235_s30 = scalar_select %p234_p12, %s770_s15, 1  ;;  %v372_v56 = vld [vmem:[%s989_s2] sm:$0xf]  ;;  %v390_v58 = vunpack.c.l.s4 %v785_v57 }
  0x2d   : > { %v907_v6 = vshrl.u32 %v254_v5, 7  ;;  %vm407_vm0 = vcmp.lt.s32.totalorder %v254_v5, 256  ;;  %s233_s11 = scalar_lea.vmem [#allocation5], %s580_s9  ;;  %s457_s23 = scalar_lea.hbm %s990_s3, %s589_s10 }
  0x2e   : > { %s581_s4 = sshll.u32 %s235_s30, 2  ;;  %v391_v61 = vunpack.c.0.s8 %v390_v58  ;;  %s459_s18 = sshll.u32 %s233_s11, 4  ;;  %s460_s18 = int_to_ptr.vmem [resolvable:$true] %s459_s18 }
  0x2f   : > { %s237_s7 = scalar_lea.vmem %s987_s0, %s581_s4  ;;  %v910_v7 = vsub.s32 0, %v907_v6  ;;  %v260_v8 = vsub.s32 4, %v907_v6  ;;  %v914_v9 = vsub.s32 1, %v907_v6  ;;  %v284_v10 = vsub.s32 5, %v907_v6  ;;  %s443_s28 = scalar_lea.sflag [#allocation4], %s893_s22 }
  0x30   : > { %v246_v2 = vld [vmem:[%s237_s7] sm:$0x7]  ;;  %v918_v12 = vsub.s32 2, %v907_v6  ;;  %v310_v13 = vsub.s32 6, %v907_v6  ;;  %v922_v14 = vsub.s32 3, %v907_v6  ;;  %v336_v15 = vsub.s32 7, %v907_v6 }
  0x31   : > { %250 = vperm.xlu0 %657, %v246_v2   ;;  %301 = vperm.xlu1 %659, %v246_v2   ;;  %v257_v16 = vrot.slane %v247_v11, %v910_v7  ;;  %v261_v17 = vrot.slane %v247_v11, %v260_v8  ;;  %v281_v18 = vrot.slane %v247_v11, %v914_v9  ;;  %s698_s29 = scalar_lea.vmem %s460_s18, 64  ;;  %s786_s30 = smov [#allocation5]  }
  0x32   : > { %v285_v19 = vrot.slane %v247_v11, %v284_v10  ;;  %v307_v20 = vrot.slane %v247_v11, %v918_v12  ;;  %v311_v21 = vrot.slane %v247_v11, %v310_v13  ;;  %v333_v24 = vrot.slane %v247_v11, %v922_v14  ;;  %p699_p8 = scmp.ne.s32.totalorder %s460_s18, %s698_s29  ;;  %s702_s4 = sshll.u32 %s786_s30, 4  ;;  %s703_s4 = int_to_ptr.vmem [resolvable:$false] %s702_s4 }
  0x33   : > { %v337_v25 = vrot.slane %v247_v11, %v336_v15  ;;  %v267_v26 = vrot.slane %v257_v16, %v910_v7  ;;  %v271_v27 = vrot.slane %v261_v17, %v910_v7  ;;  %v291_v28 = vrot.slane %v281_v18, %v914_v9  ;;  %s704_s15 = scalar_lea.vmem %s703_s4, 128  ;;  %p705_p1 = scmp.lt.s32.totalorder %s460_s18, %s703_s4 }
  0x34   : > { %v295_v29 = vrot.slane %v285_v19, %v914_v9  ;;  %v317_v30 = vrot.slane %v307_v20, %v918_v12  ;;  %v321_v31 = vrot.slane %v311_v21, %v918_v12  ;;  %v343_v32 = vrot.slane %v333_v24, %v922_v14  ;;  %p700_p11 = pnand %p699_p8, %p858_p9  ;;  %p706_p2 = scmp.lt.s32.totalorder %s704_s15, %s698_s29 }
  0x35   : > { %658 = vset.pattern.permute.xlu0 %v783_v3  ;;  %660 = vset.pattern.permute.xlu1 %v784_v4  ;;  %v347_v33 = vrot.slane %v337_v25, %v922_v14  ;;  %v413_v59 = vrot.slane %v372_v56, %v914_v9  ;;  %v417_v62 = vrot.slane %v372_v56, %v922_v14 }
  0x36   : > { %275 = vperm.xlu0 %658, %v246_v2   ;;  %327 = vperm.xlu1 %660, %v246_v2   ;;  %v377_v0 = vrot.slane %v372_v56, %v910_v7  ;;  %v381_v3 = vrot.slane %v372_v56, %v918_v12  ;;  %v394_v13 = vsub.s32 %v391_v61, %v907_v6  ;;  %p701_p0 = pneg %p700_p11  ;;  %p707_p3 = por %p706_p2, %p705_p1 }
  0x38   : > { %p708_p5 = pnand %p707_p3, %p701_p0 }
  0x3a   : > { %661 = vset.pattern.permute.xlu0 %v784_v4 }
  0xac   : > { %v251_v22 = vpop.permute.xlu0 %250  ;;  %v302_v23 = vpop.permute.xlu1 %301 }
  0xad   : > { %v272_v36 = vmul.f32 %v267_v26, %v251_v22  ;;  %v273_v37 = vmul.f32 %v271_v27, %v251_v22  ;;  %v322_v40 = vmul.f32 %v317_v30, %v302_v23  ;;  %v323_v41 = vmul.f32 %v321_v31, %v302_v23 }
  0xb1   : > { %v276_v34 = vpop.permute.xlu0 %275  ;;  %v328_v35 = vpop.permute.xlu1 %327 }
  0xb2   : > { %v296_v38 = vmul.f32 %v291_v28, %v276_v34  ;;  %v297_v39 = vmul.f32 %v295_v29, %v276_v34  ;;  %v348_v44 = vmul.f32 %v343_v32, %v328_v35  ;;  %v349_v45 = vmul.f32 %v347_v33, %v328_v35 }
  0xb4   : > { %v298_v42 = vadd.f32 %v296_v38, %v272_v36  ;;  %v299_v43 = vadd.f32 %v297_v39, %v273_v37 }
  0xb6   : > { %v324_v46 = vadd.f32 %v322_v40, %v298_v42  ;;  %v325_v47 = vadd.f32 %v323_v41, %v299_v43 }
  0xb8   : > { %v350_v48 = vadd.f32 %v348_v44, %v324_v46  ;;  %v351_v49 = vadd.f32 %v349_v45, %v325_v47 }
  0xba   : > { %v352_v50 = vadd.f32 1e-07, %v350_v48  ;;  %v353_v51 = vadd.f32 1e-07, %v351_v49 }
  0xbc   : > { %v356_v52 = vrot.slane %v352_v50, 2  ;;  %v357_v53 = vrot.slane %v353_v51, 2  ;;  %v364_v54 = vrot.slane %v352_v50, 1  ;;  %v365_v55 = vrot.slane %v353_v51, 1 }
  0xbe   : > { %662 = vrcp.f32 %v356_v52 }
  0xbf   : > { %664 = vrcp.f32 %v357_v53 }
  0xc0   : > { %666 = vrcp.f32 %v364_v54 }
  0xc1   : > { %668 = vrcp.f32 %v365_v55 }
  0xcb   : > { %v663_v60 = vpop.eup %662 }
  0xcc   : > { %v665_v63 = vpop.eup %664  ;;  %v361_v1 = vmul.f32 %v663_v60, %v350_v48 }
  0xcd   : > { %v667_v2 = vpop.eup %666  ;;  %v363_v4 = vmul.f32 %v665_v63, %v351_v49 }
  0xce   : > { %v669_v8 = vpop.eup %668  ;;  %v369_v10 = vmul.f32 %v667_v2, %v350_v48  ;;  %v420_v11 = vsub.f32 %v361_v1, %v413_v59 }
  0xcf   : > { %v371_v9 = vmul.f32 %v669_v8, %v351_v49  ;;  %v421_v15 = vsub.f32 %v363_v4, %v417_v62 }
  0xd0   : > { %v384_v16 = vsub.f32 %v369_v10, %v377_v0 }
  0xd1   : > { %v385_v17 = vsub.f32 %v371_v9, %v381_v3  ;;  %v424_v14 = vcombine.low %v420_v11, %v421_v15 }
  0xd3   : > { %v388_v18 = vcombine.low %v384_v16, %v385_v17  ;;  %v431_v7 = vrot.slane %v424_v14, %v394_v13 }
  0xd5   : > { %v395_v12 = vrot.slane %v388_v18, %v394_v13  ;;  %v438_v19 = vrot.slane %v431_v7, %v394_v13 }
  0xd7   : > { %v396_v20 = vcombine.high %v395_v12, %v395_v12  ;;  %582 = vst.msk [vmem:[%s233_s11 + $0x1] ss:$2 sm:$0x3] %vm407_vm0, %v438_v19 }
  0xd9   : > { %v403_v6 = vrot.slane %v396_v20, %v394_v13 }
  0xdb   : > { %409 = vst.msk [vmem:[%s233_s11] ss:$2 sm:$0x3] %vm407_vm0, %v403_v6 }
  0xdc   : > { %711 = shalt.err (!%p708_p5)
}
  0xdd   : > { %s712_s5 = scalar_lea.hbm %s457_s23, 64  ;;  %s716_s7 = scalar_lea.hbm %s990_s3, 128 }
  0xde   : > { %p713_p6 = scmp.ne.s32.totalorder %s457_s23, %s712_s5  ;;  %p717_p4 = scmp.lt.s32.totalorder %s457_s23, %s990_s3 }
  0xdf   : > { %p718_p13 = scmp.lt.s32.totalorder %s716_s7, %s712_s5 }
  0xe0   : > { %p714_p7 = pnand %p713_p6, %p858_p9 }
  0xe1   : > { %p719_p12 = por %p718_p13, %p717_p4 }
  0xe2   : > { %p715_p10 = pneg %p714_p7 }
  0xe4   : > { %p720_p8 = pnand %p719_p12, %p715_p10 }
  0xe6   : > { %723 = shalt.err (!%p720_p8)
}
  0xe7   : > { %592 = dma.vmem_to_hbm [thread:$0]  (%p858_p9), %s460_s18, 64, %s457_s23, %s443_s28  }
  0xe8 PF: > { %s471_s9 = sand.u32 1, %s758_s12   ;;  %p996_p11 = scmp.ne.s32.totalorder %s994_s27, 0 }
  0xe9   : > { %p997_p0 = scmp.ge.s32.totalorder %s778_s17, 2  ;;  %s472_s10 = scalar_lea.sflag [#allocation4], %s471_s9 }
  0xeb   : > { %p599_p1 = pnand %p997_p0, %p996_p11 }
  0xed   : > { %p600_p2 = pneg %p599_p1 }
  0xef   : > { %753 = dma.done.wait (%p600_p2), %s472_s10, 64  }
  0xf0   : > { %755 = vsyncadd (%p600_p2), %s472_s10, 4294967232  ;;  %s19_s17 = sadd.s32 1, %s778_s17   ;;  %s998_s12 = smov %s762_s13 }
  0xf1   : > { %p16_p3 = scmp.ge.s32.totalorder %s19_s17, 4   ;;  %s999_s13 = smov %s766_s14 }
  0xf2   : > { %s1000_s14 = smov %s863_s26  ;;  %s1001_s15 = smov %s774_s16 }
  0xf3   : > { %s1002_s16 = smov %s1004_s20  ;;  %18 = sbr.rel (!%p16_p3) target bundleno = 6 (0x6), region = 84 }
  0xf8   :  { %477 = vsyncpa [#allocation3], 1 }
  0xf9   :  { %479 = vsyncpa [#allocation3 + $0x1], 1 }
  0xfa   :  { %480 = vsyncpa [#allocation4], 1 }
  0xfb   :  { %482 = vsyncpa [#allocation4 + $0x1], 1 }

</bundles_post_ra>
